<compile_context>
chip_gen: v7x
topology: tpu7x:2x2x1
jax: 0.10.0
libtpu: 0.0.40
codegen_flags: <defaults>
</compile_context>

<pallas_src>
import math
import jax
import jax.numpy as jnp
from jax import lax
from jax.experimental import pallas as pl
from jax.experimental.pallas import tpu as pltpu

E = 32            # embedding_size
H = 4             # no_of_heads
D = E // H        # head_size
FWD_EXP = 4
FE = FWD_EXP * E  # feed-forward hidden size
EPS = 1e-5        # nn.LayerNorm default eps


def _layernorm(v, g, b):
    # PyTorch LayerNorm: biased variance over last dim, eps inside sqrt, affine.
    mean = jnp.mean(v, axis=-1, keepdims=True)
    var = jnp.mean((v - mean) ** 2, axis=-1, keepdims=True)
    return (v - mean) * lax.rsqrt(var + EPS) * g + b


def decoder_block_kernel(x_ref, value_ref,
                         wv1, wfc1, bfc1, gn, bn,
                         wv2, wfc2, bfc2, g1, b1,
                         wff1, bff1, wff2, bff2, g2, b2,
                         o_ref):
    N, T, E_ = x_ref.shape
    S = value_ref.shape[1]

    # Flatten to row-major 2-D slabs (last dim unchanged -> cheap relayout).
    x = x_ref[...].reshape(N * T, E_)        # decoder input rows   (N*T, E)
    v = value_ref[...].reshape(N * S, E_)    # encoder value rows   (N*S, E)

    # Per-batch sums over the sequence axis (static unroll; N is tiny & static).
    xsum = jnp.concatenate(
        [jnp.sum(x[n * T:(n + 1) * T], axis=0, keepdims=True) for n in range(N)], axis=0)
    vsum = jnp.concatenate(
        [jnp.sum(v[n * S:(n + 1) * S], axis=0, keepdims=True) for n in range(N)], axis=0)

    # Degenerate attention output: one row per batch element.
    #   row = (sum_seq input) @ blockdiag(Wv^T) @ Wfc^T + bfc
    row1 = jnp.dot(jnp.dot(xsum, wv1[...], preferred_element_type=jnp.float32),
                   wfc1[...], preferred_element_type=jnp.float32) + bfc1[...]
    row2 = jnp.dot(jnp.dot(vsum, wv2[...], preferred_element_type=jnp.float32),
                   wfc2[...], preferred_element_type=jnp.float32) + bfc2[...]

    # Broadcast each batch row over its T query positions -> (N*T, E).
    attn1 = jnp.concatenate(
        [jnp.broadcast_to(row1[n:n + 1], (T, E_)) for n in range(N)], axis=0)
    attn2 = jnp.concatenate(
        [jnp.broadcast_to(row2[n:n + 1], (T, E_)) for n in range(N)], axis=0)

    # query = dropout(norm(attention + x))   (dropout = identity in eval)
    query = _layernorm(attn1 + x, gn[...], bn[...])

    # transformer block: cross-attention + norm + FFN + norm
    x2 = _layernorm(attn2 + query, g1[...], b1[...])
    hidden = jnp.maximum(
        jnp.dot(x2, wff1[...], preferred_element_type=jnp.float32) + bff1[...], 0.0)
    ff = jnp.dot(hidden, wff2[...], preferred_element_type=jnp.float32) + bff2[...]
    out = _layernorm(ff + x2, g2[...], b2[...])

    o_ref[...] = out.reshape(N, T, E_).astype(o_ref.dtype)


def decoder_block(x, value, key, source_mask, target_mask, params):
    """x: (N, T, E), value/key: (N, S, E), source_mask: (N,1,1,S), target_mask: (N,1,T,T).

    `key`, `source_mask`, `target_mask` (and the wq/wk weights) are accepted for API
    parity with the PyTorch module but cannot influence its output: the reference
    einsum 'nhqk,nvhd->nqhd' makes the attention independent of Q, K and the masks
    (softmax rows sum to 1), so they are not shipped to the kernel at all."""
    del key, source_mask, target_mask
    N, T, _ = x.shape

    # Fuse the per-head (D,D) value projections into one block-diagonal (E,E) matrix.
    eyeH = jnp.eye(H, dtype=jnp.float32)
    wv1_bd = jnp.kron(eyeH, params["wv1"])
    wv2_bd = jnp.kron(eyeH, params["wv2"])

    kernel_params = [
        wv1_bd, params["wfc1"], params["bfc1"], params["gn"], params["bn"],
        wv2_bd, params["wfc2"], params["bfc2"], params["g1"], params["b1"],
        params["wff1"], params["bff1"], params["wff2"], params["bff2"],
        params["g2"], params["b2"],
    ]

    vmem = pl.BlockSpec(memory_space=pltpu.MemorySpace.VMEM)
    return pl.pallas_call(
        decoder_block_kernel,
        out_shape=jax.ShapeDtypeStruct((N, T, E), jnp.float32),
        in_specs=[vmem] * (2 + len(kernel_params)),
        out_specs=vmem,
    )(x, value, *kernel_params)


def init_params(seed=42):
    """Deterministic parameter init (shapes per the PyTorch module __init__).
    Linear weights stored pre-transposed (in_features, out_features); biases as (1, out)."""
    keys = jax.random.split(jax.random.PRNGKey(seed), 20)

    def lin_w(k, out_f, in_f):
        bound = 1.0 / math.sqrt(in_f)
        return jax.random.uniform(k, (out_f, in_f), jnp.float32, -bound, bound).T

    def lin_b(k, out_f, in_f):
        bound = 1.0 / math.sqrt(in_f)
        return jax.random.uniform(k, (1, out_f), jnp.float32, -bound, bound)

    p = {}
    # SelfAttention #1 (masked self-attention of the decoder block)
    p["wq1"] = lin_w(keys[0], D, D)
    p["wk1"] = lin_w(keys[1], D, D)
    p["wv1"] = lin_w(keys[2], D, D)
    p["wfc1"] = lin_w(keys[3], E, E)
    p["bfc1"] = lin_b(keys[4], E, E)
    # DecoderBlock.norm
    p["gn"] = jnp.ones((1, E), jnp.float32)
    p["bn"] = jnp.zeros((1, E), jnp.float32)
    # SelfAttention #2 (inside TransformerBlock)
    p["wq2"] = lin_w(keys[5], D, D)
    p["wk2"] = lin_w(keys[6], D, D)
    p["wv2"] = lin_w(keys[7], D, D)
    p["wfc2"] = lin_w(keys[8], E, E)
    p["bfc2"] = lin_b(keys[9], E, E)
    # TransformerBlock.norm1
    p["g1"] = jnp.ones((1, E), jnp.float32)
    p["b1"] = jnp.zeros((1, E), jnp.float32)
    # feed forward: Linear(E, FE) -> ReLU -> Linear(FE, E)
    p["wff1"] = lin_w(keys[10], FE, E)
    p["bff1"] = lin_b(keys[11], FE, E)
    p["wff2"] = lin_w(keys[12], E, FE)
    p["bff2"] = lin_b(keys[13], E, FE)
    # TransformerBlock.norm2
    p["g2"] = jnp.ones((1, E), jnp.float32)
    p["b2"] = jnp.zeros((1, E), jnp.float32)
    return p


# ---------- faithful pure-JAX port of the PyTorch module (for verification) ----------
def _ref_attention(q, k, v, mask, wq, wk, wv, wfc, bfc):
    N_, Lq, _ = q.shape
    Lk, Lv = k.shape[1], v.shape[1]
    qh = jnp.matmul(q.reshape(N_, Lq, H, D), wq)
    kh = jnp.matmul(k.reshape(N_, Lk, H, D), wk)
    vh = jnp.matmul(v.reshape(N_, Lv, H, D), wv)
    energy = jnp.einsum('nqhd,nkhd->nhqk', qh, kh)
    energy = jnp.where(mask == 0, -jnp.inf, energy)
    attn = jax.nn.softmax(energy / math.sqrt(E), axis=-1)
    out = jnp.einsum('nhqk,nvhd->nqhd', attn, vh).reshape(N_, Lq, E)
    return jnp.matmul(out, wfc) + bfc


def decoder_block_reference(x, value, key, source_mask, target_mask, p):
    a1 = _ref_attention(x, x, x, target_mask,
                        p["wq1"], p["wk1"], p["wv1"], p["wfc1"], p["bfc1"])
    query = _layernorm(a1 + x, p["gn"], p["bn"])
    a2 = _ref_attention(query, key, value, source_mask,
                        p["wq2"], p["wk2"], p["wv2"], p["wfc2"], p["bfc2"])
    x2 = _layernorm(a2 + query, p["g1"], p["b1"])
    hidden = jnp.maximum(jnp.matmul(x2, p["wff1"]) + p["bff1"], 0.0)
    ff = jnp.matmul(hidden, p["wff2"]) + p["bff2"]
    return _layernorm(ff + x2, p["g2"], p["b2"])


if __name__ == "__main__":
    N, T, S = 2, 8, 8
    root = jax.random.PRNGKey(0)
    kx, kv, kk = jax.random.split(root, 3)
    x = jax.random.normal(kx, (N, T, E), jnp.float32)        # decoder input
    value = jax.random.normal(kv, (N, S, E), jnp.float32)    # encoder output (value)
    key_t = jax.random.normal(kk, (N, S, E), jnp.float32)    # encoder output (key)

    # target_mask: causal (N, 1, T, T); source_mask: all ones (N, 1, 1, S)
    target_mask = jnp.broadcast_to(
        jnp.tril(jnp.ones((T, T), jnp.float32))[None, None], (N, 1, T, T))
    source_mask = jnp.ones((N, 1, 1, S), jnp.float32)

    params = init_params()
    out = decoder_block(x, value, key_t, source_mask, target_mask, params)
    out = jax.block_until_ready(out)
    assert out.shape == (N, T, E) and out.dtype == jnp.float32
    assert bool(jnp.all(jnp.isfinite(out)))

    # Cross-check against the faithful pure-JAX port of the PyTorch module (including
    # the original masking + softmax + 'nhqk,nvhd->nqhd' path).  Loose tolerance only
    # accommodates TPU matmul-precision differences; structural errors would be O(1).
    with jax.default_matmul_precision("highest"):
        ref = decoder_block_reference(x, value, key_t, source_mask, target_mask, params)
    assert bool(jnp.allclose(out, ref, atol=2e-2, rtol=2e-2)), \
        float(jnp.max(jnp.abs(out - ref)))

    print("KERNEL_OK")
</pallas_src>

<mosaic_0001>
module attributes {stable_mosaic.version = 11 : i64} {
  func.func @decoder_block_kernel(%arg0: memref<2x8x32xf32, #tpu.memory_space<vmem>>, %arg1: memref<2x8x32xf32, #tpu.memory_space<vmem>>, %arg2: memref<32x32xf32, #tpu.memory_space<vmem>>, %arg3: memref<32x32xf32, #tpu.memory_space<vmem>>, %arg4: memref<1x32xf32, #tpu.memory_space<vmem>>, %arg5: memref<1x32xf32, #tpu.memory_space<vmem>>, %arg6: memref<1x32xf32, #tpu.memory_space<vmem>>, %arg7: memref<32x32xf32, #tpu.memory_space<vmem>>, %arg8: memref<32x32xf32, #tpu.memory_space<vmem>>, %arg9: memref<1x32xf32, #tpu.memory_space<vmem>>, %arg10: memref<1x32xf32, #tpu.memory_space<vmem>>, %arg11: memref<1x32xf32, #tpu.memory_space<vmem>>, %arg12: memref<32x128xf32, #tpu.memory_space<vmem>>, %arg13: memref<1x128xf32, #tpu.memory_space<vmem>>, %arg14: memref<128x32xf32, #tpu.memory_space<vmem>>, %arg15: memref<1x32xf32, #tpu.memory_space<vmem>>, %arg16: memref<1x32xf32, #tpu.memory_space<vmem>>, %arg17: memref<1x32xf32, #tpu.memory_space<vmem>>, %arg18: memref<2x8x32xf32, #tpu.memory_space<vmem>>) attributes {dimension_semantics = [], scalar_prefetch = 0 : i64, scratch_operands = 0 : i64, tpu.core_type = #tpu.core_type<tc>} {
    %c0 = arith.constant 0 : index
    %c0_0 = arith.constant 0 : index
    %c0_1 = arith.constant 0 : index
    %0 = vector.load %arg0[%c0, %c0_0, %c0_1] : memref<2x8x32xf32, #tpu.memory_space<vmem>>, vector<2x8x32xf32>
    %1 = vector.shape_cast %0 : vector<2x8x32xf32> to vector<16x32xf32>
    %c0_2 = arith.constant 0 : index
    %c0_3 = arith.constant 0 : index
    %c0_4 = arith.constant 0 : index
    %2 = vector.load %arg1[%c0_2, %c0_3, %c0_4] : memref<2x8x32xf32, #tpu.memory_space<vmem>>, vector<2x8x32xf32>
    %3 = vector.shape_cast %2 : vector<2x8x32xf32> to vector<16x32xf32>
    %4 = vector.extract_strided_slice %1 {offsets = [0, 0], sizes = [8, 32], strides = [1, 1]} : vector<16x32xf32> to vector<8x32xf32>
    %cst = arith.constant dense<0.000000e+00> : vector<32xf32>
    %5 = vector.multi_reduction <add>, %4, %cst [0] : vector<8x32xf32> to vector<32xf32>
    %6 = vector.shape_cast %5 : vector<32xf32> to vector<1x32xf32>
    %7 = vector.extract_strided_slice %1 {offsets = [8, 0], sizes = [8, 32], strides = [1, 1]} : vector<16x32xf32> to vector<8x32xf32>
    %cst_5 = arith.constant dense<0.000000e+00> : vector<32xf32>
    %8 = vector.multi_reduction <add>, %7, %cst_5 [0] : vector<8x32xf32> to vector<32xf32>
    %9 = vector.shape_cast %8 : vector<32xf32> to vector<1x32xf32>
    %10 = tpu.concatenate %6, %9 in 0 : vector<1x32xf32>, vector<1x32xf32> -> vector<2x32xf32>
    %11 = vector.extract_strided_slice %3 {offsets = [0, 0], sizes = [8, 32], strides = [1, 1]} : vector<16x32xf32> to vector<8x32xf32>
    %cst_6 = arith.constant dense<0.000000e+00> : vector<32xf32>
    %12 = vector.multi_reduction <add>, %11, %cst_6 [0] : vector<8x32xf32> to vector<32xf32>
    %13 = vector.shape_cast %12 : vector<32xf32> to vector<1x32xf32>
    %14 = vector.extract_strided_slice %3 {offsets = [8, 0], sizes = [8, 32], strides = [1, 1]} : vector<16x32xf32> to vector<8x32xf32>
    %cst_7 = arith.constant dense<0.000000e+00> : vector<32xf32>
    %15 = vector.multi_reduction <add>, %14, %cst_7 [0] : vector<8x32xf32> to vector<32xf32>
    %16 = vector.shape_cast %15 : vector<32xf32> to vector<1x32xf32>
    %17 = tpu.concatenate %13, %16 in 0 : vector<1x32xf32>, vector<1x32xf32> -> vector<2x32xf32>
    %c0_8 = arith.constant 0 : index
    %c0_9 = arith.constant 0 : index
    %18 = vector.load %arg2[%c0_8, %c0_9] : memref<32x32xf32, #tpu.memory_space<vmem>>, vector<32x32xf32>
    %cst_10 = arith.constant dense<0.000000e+00> : vector<2x32xf32>
    %19 = tpu.matmul %10, %18, %cst_10 {dimension_numbers = #tpu.dot_dimension_numbers<[1], [0], [0], [1], [0, 0, 1, 1], [], []>} : vector<2x32xf32>, vector<32x32xf32>, vector<2x32xf32> -> vector<2x32xf32>
    %c0_11 = arith.constant 0 : index
    %c0_12 = arith.constant 0 : index
    %20 = vector.load %arg3[%c0_11, %c0_12] : memref<32x32xf32, #tpu.memory_space<vmem>>, vector<32x32xf32>
    %cst_13 = arith.constant dense<0.000000e+00> : vector<2x32xf32>
    %21 = tpu.matmul %19, %20, %cst_13 {dimension_numbers = #tpu.dot_dimension_numbers<[1], [0], [0], [1], [0, 0, 1, 1], [], []>} : vector<2x32xf32>, vector<32x32xf32>, vector<2x32xf32> -> vector<2x32xf32>
    %c0_14 = arith.constant 0 : index
    %c0_15 = arith.constant 0 : index
    %22 = vector.load %arg4[%c0_14, %c0_15] : memref<1x32xf32, #tpu.memory_space<vmem>>, vector<1x32xf32>
    %23 = vector.broadcast %22 : vector<1x32xf32> to vector<2x32xf32>
    %24 = arith.addf %21, %23 : vector<2x32xf32>
    %c0_16 = arith.constant 0 : index
    %c0_17 = arith.constant 0 : index
    %25 = vector.load %arg7[%c0_16, %c0_17] : memref<32x32xf32, #tpu.memory_space<vmem>>, vector<32x32xf32>
    %cst_18 = arith.constant dense<0.000000e+00> : vector<2x32xf32>
    %26 = tpu.matmul %17, %25, %cst_18 {dimension_numbers = #tpu.dot_dimension_numbers<[1], [0], [0], [1], [0, 0, 1, 1], [], []>} : vector<2x32xf32>, vector<32x32xf32>, vector<2x32xf32> -> vector<2x32xf32>
    %c0_19 = arith.constant 0 : index
    %c0_20 = arith.constant 0 : index
    %27 = vector.load %arg8[%c0_19, %c0_20] : memref<32x32xf32, #tpu.memory_space<vmem>>, vector<32x32xf32>
    %cst_21 = arith.constant dense<0.000000e+00> : vector<2x32xf32>
    %28 = tpu.matmul %26, %27, %cst_21 {dimension_numbers = #tpu.dot_dimension_numbers<[1], [0], [0], [1], [0, 0, 1, 1], [], []>} : vector<2x32xf32>, vector<32x32xf32>, vector<2x32xf32> -> vector<2x32xf32>
    %c0_22 = arith.constant 0 : index
    %c0_23 = arith.constant 0 : index
    %29 = vector.load %arg9[%c0_22, %c0_23] : memref<1x32xf32, #tpu.memory_space<vmem>>, vector<1x32xf32>
    %30 = vector.broadcast %29 : vector<1x32xf32> to vector<2x32xf32>
    %31 = arith.addf %28, %30 : vector<2x32xf32>
    %32 = vector.extract_strided_slice %24 {offsets = [0, 0], sizes = [1, 32], strides = [1, 1]} : vector<2x32xf32> to vector<1x32xf32>
    %33 = vector.shape_cast %32 : vector<1x32xf32> to vector<1x32xf32>
    %34 = vector.broadcast %33 : vector<1x32xf32> to vector<8x32xf32>
    %35 = vector.extract_strided_slice %24 {offsets = [1, 0], sizes = [1, 32], strides = [1, 1]} : vector<2x32xf32> to vector<1x32xf32>
    %36 = vector.shape_cast %35 : vector<1x32xf32> to vector<1x32xf32>
    %37 = vector.broadcast %36 : vector<1x32xf32> to vector<8x32xf32>
    %38 = tpu.concatenate %34, %37 in 0 : vector<8x32xf32>, vector<8x32xf32> -> vector<16x32xf32>
    %39 = vector.extract_strided_slice %31 {offsets = [0, 0], sizes = [1, 32], strides = [1, 1]} : vector<2x32xf32> to vector<1x32xf32>
    %40 = vector.shape_cast %39 : vector<1x32xf32> to vector<1x32xf32>
    %41 = vector.broadcast %40 : vector<1x32xf32> to vector<8x32xf32>
    %42 = vector.extract_strided_slice %31 {offsets = [1, 0], sizes = [1, 32], strides = [1, 1]} : vector<2x32xf32> to vector<1x32xf32>
    %43 = vector.shape_cast %42 : vector<1x32xf32> to vector<1x32xf32>
    %44 = vector.broadcast %43 : vector<1x32xf32> to vector<8x32xf32>
    %45 = tpu.concatenate %41, %44 in 0 : vector<8x32xf32>, vector<8x32xf32> -> vector<16x32xf32>
    %46 = arith.addf %38, %1 : vector<16x32xf32>
    %c0_24 = arith.constant 0 : index
    %c0_25 = arith.constant 0 : index
    %47 = vector.load %arg5[%c0_24, %c0_25] : memref<1x32xf32, #tpu.memory_space<vmem>>, vector<1x32xf32>
    %c0_26 = arith.constant 0 : index
    %c0_27 = arith.constant 0 : index
    %48 = vector.load %arg6[%c0_26, %c0_27] : memref<1x32xf32, #tpu.memory_space<vmem>>, vector<1x32xf32>
    %cst_28 = arith.constant dense<0.000000e+00> : vector<16xf32>
    %49 = vector.multi_reduction <add>, %46, %cst_28 [1] : vector<16x32xf32> to vector<16xf32>
    %50 = vector.shape_cast %49 : vector<16xf32> to vector<16x1xf32>
    %cst_29 = arith.constant 3.200000e+01 : f32
    %51 = vector.broadcast %cst_29 : f32 to vector<16x1xf32>
    %52 = arith.divf %50, %51 : vector<16x1xf32>
    %53 = vector.broadcast %52 : vector<16x1xf32> to vector<16x32xf32>
    %54 = arith.subf %46, %53 : vector<16x32xf32>
    %55 = arith.mulf %54, %54 : vector<16x32xf32>
    %cst_30 = arith.constant dense<0.000000e+00> : vector<16xf32>
    %56 = vector.multi_reduction <add>, %55, %cst_30 [1] : vector<16x32xf32> to vector<16xf32>
    %57 = vector.shape_cast %56 : vector<16xf32> to vector<16x1xf32>
    %cst_31 = arith.constant 3.200000e+01 : f32
    %58 = vector.broadcast %cst_31 : f32 to vector<16x1xf32>
    %59 = arith.divf %57, %58 : vector<16x1xf32>
    %60 = vector.broadcast %52 : vector<16x1xf32> to vector<16x32xf32>
    %61 = arith.subf %46, %60 : vector<16x32xf32>
    %cst_32 = arith.constant 9.99999974E-6 : f32
    %62 = vector.broadcast %cst_32 : f32 to vector<16x1xf32>
    %63 = arith.addf %59, %62 : vector<16x1xf32>
    %64 = math.rsqrt %63 : vector<16x1xf32>
    %65 = vector.broadcast %64 : vector<16x1xf32> to vector<16x32xf32>
    %66 = arith.mulf %61, %65 : vector<16x32xf32>
    %67 = vector.broadcast %47 : vector<1x32xf32> to vector<16x32xf32>
    %68 = arith.mulf %66, %67 : vector<16x32xf32>
    %69 = vector.broadcast %48 : vector<1x32xf32> to vector<16x32xf32>
    %70 = arith.addf %68, %69 : vector<16x32xf32>
    %71 = arith.addf %45, %70 : vector<16x32xf32>
    %c0_33 = arith.constant 0 : index
    %c0_34 = arith.constant 0 : index
    %72 = vector.load %arg10[%c0_33, %c0_34] : memref<1x32xf32, #tpu.memory_space<vmem>>, vector<1x32xf32>
    %c0_35 = arith.constant 0 : index
    %c0_36 = arith.constant 0 : index
    %73 = vector.load %arg11[%c0_35, %c0_36] : memref<1x32xf32, #tpu.memory_space<vmem>>, vector<1x32xf32>
    %cst_37 = arith.constant dense<0.000000e+00> : vector<16xf32>
    %74 = vector.multi_reduction <add>, %71, %cst_37 [1] : vector<16x32xf32> to vector<16xf32>
    %75 = vector.shape_cast %74 : vector<16xf32> to vector<16x1xf32>
    %cst_38 = arith.constant 3.200000e+01 : f32
    %76 = vector.broadcast %cst_38 : f32 to vector<16x1xf32>
    %77 = arith.divf %75, %76 : vector<16x1xf32>
    %78 = vector.broadcast %77 : vector<16x1xf32> to vector<16x32xf32>
    %79 = arith.subf %71, %78 : vector<16x32xf32>
    %80 = arith.mulf %79, %79 : vector<16x32xf32>
    %cst_39 = arith.constant dense<0.000000e+00> : vector<16xf32>
    %81 = vector.multi_reduction <add>, %80, %cst_39 [1] : vector<16x32xf32> to vector<16xf32>
    %82 = vector.shape_cast %81 : vector<16xf32> to vector<16x1xf32>
    %cst_40 = arith.constant 3.200000e+01 : f32
    %83 = vector.broadcast %cst_40 : f32 to vector<16x1xf32>
    %84 = arith.divf %82, %83 : vector<16x1xf32>
    %85 = vector.broadcast %77 : vector<16x1xf32> to vector<16x32xf32>
    %86 = arith.subf %71, %85 : vector<16x32xf32>
    %cst_41 = arith.constant 9.99999974E-6 : f32
    %87 = vector.broadcast %cst_41 : f32 to vector<16x1xf32>
    %88 = arith.addf %84, %87 : vector<16x1xf32>
    %89 = math.rsqrt %88 : vector<16x1xf32>
    %90 = vector.broadcast %89 : vector<16x1xf32> to vector<16x32xf32>
    %91 = arith.mulf %86, %90 : vector<16x32xf32>
    %92 = vector.broadcast %72 : vector<1x32xf32> to vector<16x32xf32>
    %93 = arith.mulf %91, %92 : vector<16x32xf32>
    %94 = vector.broadcast %73 : vector<1x32xf32> to vector<16x32xf32>
    %95 = arith.addf %93, %94 : vector<16x32xf32>
    %c0_42 = arith.constant 0 : index
    %c0_43 = arith.constant 0 : index
    %96 = vector.load %arg12[%c0_42, %c0_43] : memref<32x128xf32, #tpu.memory_space<vmem>>, vector<32x128xf32>
    %cst_44 = arith.constant dense<0.000000e+00> : vector<16x128xf32>
    %97 = tpu.matmul %95, %96, %cst_44 {dimension_numbers = #tpu.dot_dimension_numbers<[1], [0], [0], [1], [0, 0, 1, 1], [], []>} : vector<16x32xf32>, vector<32x128xf32>, vector<16x128xf32> -> vector<16x128xf32>
    %c0_45 = arith.constant 0 : index
    %c0_46 = arith.constant 0 : index
    %98 = vector.load %arg13[%c0_45, %c0_46] : memref<1x128xf32, #tpu.memory_space<vmem>>, vector<1x128xf32>
    %99 = vector.broadcast %98 : vector<1x128xf32> to vector<16x128xf32>
    %100 = arith.addf %97, %99 : vector<16x128xf32>
    %cst_47 = arith.constant 0.000000e+00 : f32
    %101 = vector.broadcast %cst_47 : f32 to vector<16x128xf32>
    %102 = arith.maximumf %100, %101 : vector<16x128xf32>
    %c0_48 = arith.constant 0 : index
    %c0_49 = arith.constant 0 : index
    %103 = vector.load %arg14[%c0_48, %c0_49] : memref<128x32xf32, #tpu.memory_space<vmem>>, vector<128x32xf32>
    %cst_50 = arith.constant dense<0.000000e+00> : vector<16x32xf32>
    %104 = tpu.matmul %102, %103, %cst_50 {dimension_numbers = #tpu.dot_dimension_numbers<[1], [0], [0], [1], [0, 0, 1, 1], [], []>} : vector<16x128xf32>, vector<128x32xf32>, vector<16x32xf32> -> vector<16x32xf32>
    %c0_51 = arith.constant 0 : index
    %c0_52 = arith.constant 0 : index
    %105 = vector.load %arg15[%c0_51, %c0_52] : memref<1x32xf32, #tpu.memory_space<vmem>>, vector<1x32xf32>
    %106 = vector.broadcast %105 : vector<1x32xf32> to vector<16x32xf32>
    %107 = arith.addf %104, %106 : vector<16x32xf32>
    %108 = arith.addf %107, %95 : vector<16x32xf32>
    %c0_53 = arith.constant 0 : index
    %c0_54 = arith.constant 0 : index
    %109 = vector.load %arg16[%c0_53, %c0_54] : memref<1x32xf32, #tpu.memory_space<vmem>>, vector<1x32xf32>
    %c0_55 = arith.constant 0 : index
    %c0_56 = arith.constant 0 : index
    %110 = vector.load %arg17[%c0_55, %c0_56] : memref<1x32xf32, #tpu.memory_space<vmem>>, vector<1x32xf32>
    %cst_57 = arith.constant dense<0.000000e+00> : vector<16xf32>
    %111 = vector.multi_reduction <add>, %108, %cst_57 [1] : vector<16x32xf32> to vector<16xf32>
    %112 = vector.shape_cast %111 : vector<16xf32> to vector<16x1xf32>
    %cst_58 = arith.constant 3.200000e+01 : f32
    %113 = vector.broadcast %cst_58 : f32 to vector<16x1xf32>
    %114 = arith.divf %112, %113 : vector<16x1xf32>
    %115 = vector.broadcast %114 : vector<16x1xf32> to vector<16x32xf32>
    %116 = arith.subf %108, %115 : vector<16x32xf32>
    %117 = arith.mulf %116, %116 : vector<16x32xf32>
    %cst_59 = arith.constant dense<0.000000e+00> : vector<16xf32>
    %118 = vector.multi_reduction <add>, %117, %cst_59 [1] : vector<16x32xf32> to vector<16xf32>
    %119 = vector.shape_cast %118 : vector<16xf32> to vector<16x1xf32>
    %cst_60 = arith.constant 3.200000e+01 : f32
    %120 = vector.broadcast %cst_60 : f32 to vector<16x1xf32>
    %121 = arith.divf %119, %120 : vector<16x1xf32>
    %122 = vector.broadcast %114 : vector<16x1xf32> to vector<16x32xf32>
    %123 = arith.subf %108, %122 : vector<16x32xf32>
    %cst_61 = arith.constant 9.99999974E-6 : f32
    %124 = vector.broadcast %cst_61 : f32 to vector<16x1xf32>
    %125 = arith.addf %121, %124 : vector<16x1xf32>
    %126 = math.rsqrt %125 : vector<16x1xf32>
    %127 = vector.broadcast %126 : vector<16x1xf32> to vector<16x32xf32>
    %128 = arith.mulf %123, %127 : vector<16x32xf32>
    %129 = vector.broadcast %109 : vector<1x32xf32> to vector<16x32xf32>
    %130 = arith.mulf %128, %129 : vector<16x32xf32>
    %131 = vector.broadcast %110 : vector<1x32xf32> to vector<16x32xf32>
    %132 = arith.addf %130, %131 : vector<16x32xf32>
    %133 = vector.shape_cast %132 : vector<16x32xf32> to vector<2x8x32xf32>
    %c0_62 = arith.constant 0 : index
    %c0_63 = arith.constant 0 : index
    %c0_64 = arith.constant 0 : index
    %134 = vector.load %arg18[%c0_62, %c0_63, %c0_64] : memref<2x8x32xf32, #tpu.memory_space<vmem>>, vector<2x8x32xf32>
    tpu.vector_store %arg18[%c0_62, %c0_63, %c0_64], %133 {strides = array<i32>} : memref<2x8x32xf32, #tpu.memory_space<vmem>>, vector<2x8x32xf32>,
    return
  }
}

</mosaic_0001>

<bundles_post_ra>
// kernel: tpu_custom_call.1
= control target key start
LH: loop header
LB: loop body
LE: loop exit
PB: predicated region body
PF: predicated region fallthrough
CT: control target
= control target key end

     0   :  { %s1465_s0 = inlined_call_operand.hbm [shape: f32[2,8,32], index: 0, kind: input, shape index: {}]   ;;  %s1466_s1 = inlined_call_operand.hbm [shape: f32[2,8,32], index: 1, kind: input, shape index: {}]   ;;  %s1467_s2 = inlined_call_operand.vmem [shape: f32[32,32], index: 2, kind: input, shape index: {}]   ;;  %s1468_s3 = inlined_call_operand.vmem [shape: f32[32,32], index: 3, kind: input, shape index: {}]   ;;  %s1469_s4 = inlined_call_operand.vmem [shape: f32[1,32], index: 4, kind: input, shape index: {}]   ;;  %s1470_s5 = inlined_call_operand.vmem [shape: f32[1,32], index: 5, kind: input, shape index: {}]   ;;  %s1471_s6 = inlined_call_operand.vmem [shape: f32[1,32], index: 6, kind: input, shape index: {}]   ;;  %s1472_s7 = inlined_call_operand.vmem [shape: f32[32,32], index: 7, kind: input, shape index: {}]   ;;  %s1473_s8 = inlined_call_operand.vmem [shape: f32[32,32], index: 8, kind: input, shape index: {}]   ;;  %s1474_s9 = inlined_call_operand.vmem [shape: f32[1,32], index: 9, kind: input, shape index: {}]   ;;  %s1475_s10 = inlined_call_operand.vmem [shape: f32[1,32], index: 10, kind: input, shape index: {}]   ;;  %s1476_s11 = inlined_call_operand.vmem [shape: f32[1,32], index: 11, kind: input, shape index: {}]   ;;  %s1477_s12 = inlined_call_operand.vmem [shape: f32[32,128], index: 12, kind: input, shape index: {}]   ;;  %s1478_s13 = inlined_call_operand.vmem [shape: f32[1,128], index: 13, kind: input, shape index: {}]   ;;  %s1479_s14 = inlined_call_operand.vmem [shape: f32[128,32], index: 14, kind: input, shape index: {}]   ;;  %s1480_s15 = inlined_call_operand.vmem [shape: f32[1,32], index: 15, kind: input, shape index: {}]   ;;  %s1481_s16 = inlined_call_operand.vmem [shape: f32[1,32], index: 16, kind: input, shape index: {}]   ;;  %s1482_s17 = inlined_call_operand.vmem [shape: f32[1,32], index: 17, kind: input, shape index: {}]   ;;  %s1483_s18 = inlined_call_operand.hbm [shape: f32[2,8,32], index: 18, kind: output, shape index: {}]  }
   0x1   :  { %1488 = sst [smem:[#allocation11_spill]] %s1465_s0 }
   0x2   :  { %1489 = sst [smem:[#allocation12_spill]] %s1466_s1 }
   0x3   :  { %1490 = sst [smem:[#allocation13_spill]] %s1467_s2 }
   0x4   :  { %1491 = sst [smem:[#allocation14_spill]] %s1482_s17 }
   0x5   :  { %1492 = sst [smem:[#allocation15_spill]] %s1483_s18 }
   0x6   :  { %23 = vsyncpa [#allocation3], 0 }
   0x7   :  { %24 = vsyncpa [#allocation6], 0 }
   0x8   :  { %25 = vsyncpa [#allocation4], 0  ;;  %s1119_s27 = smov [#allocation2]   ;;  %s1493_s0 = sld [smem:[#allocation11_spill]] }
   0x9   :  { %s31_s28 = sshll.u32 %s1119_s27, 4  ;;  %s32_s28 = int_to_ptr.vmem [resolvable:$true] %s31_s28 }
   0xe   :  { %s1047_s19 = scalar_lea.hbm %s1493_s0, 256 }
   0xf   :  { %p1048_p0 = scmp.ne.s32.totalorder %s1493_s0, %s1047_s19  ;;  %p1051_p1 = scmp.lt.u32.totalorder %s1047_s19, %s1493_s0 }
  0x11   :  { %p1053_p2 = pnand %p1051_p1, %p1048_p0 }
  0x13   :  { %1056 = shalt.err (!%p1053_p2)
}
  0x14   :  { %s1057_s2 = scalar_lea.vmem %s32_s28, 256  ;;  %p1062_p4 = scmp.lt.s32.totalorder %s32_s28, %s32_s28 }
  0x15   :  { %p1058_p3 = scmp.ne.s32.totalorder %s32_s28, %s1057_s2  ;;  %p1063_p5 = scmp.lt.s32.totalorder %s1057_s2, %s1057_s2 }
  0x17   :  { %p1064_p6 = por %p1063_p5, %p1062_p4 }
  0x19   :  { %p1065_p7 = pnand %p1064_p6, %p1058_p3 }
  0x1b   :  { %1068 = shalt.err (!%p1065_p7)
}
  0x1c   :  { %s1120_s23 = smov 128   ;;  %s1121_s24 = smov 8  }
  0x1d   :  { %37 = dma.hbm_to_vmem [thread:$0]  %s1493_s0, 256, %s32_s28, [#allocation3], %s1120_s23, %s1120_s23, %s1121_s24  }
  0x1e   :  { %s1122_s27 = smov [#allocation5]   ;;  %s1494_s1 = sld [smem:[#allocation12_spill]] }
  0x1f   :  { %s43_s29 = sshll.u32 %s1122_s27, 4  ;;  %s44_s29 = int_to_ptr.vmem [resolvable:$true] %s43_s29 }
  0x24   :  { %s1069_s20 = scalar_lea.hbm %s1494_s1, 256 }
  0x25   :  { %p1070_p8 = scmp.ne.s32.totalorder %s1494_s1, %s1069_s20  ;;  %p1073_p9 = scmp.lt.u32.totalorder %s1069_s20, %s1494_s1 }
  0x27   :  { %p1075_p10 = pnand %p1073_p9, %p1070_p8 }
  0x29   :  { %1078 = shalt.err (!%p1075_p10)
}
  0x2a   :  { %s1079_s17 = scalar_lea.vmem %s44_s29, 256  ;;  %p1084_p12 = scmp.lt.s32.totalorder %s44_s29, %s44_s29 }
  0x2b   :  { %p1080_p11 = scmp.ne.s32.totalorder %s44_s29, %s1079_s17  ;;  %p1085_p13 = scmp.lt.s32.totalorder %s1079_s17, %s1079_s17 }
  0x2d   :  { %p1086_p0 = por %p1085_p13, %p1084_p12 }
  0x2f   :  { %p1087_p1 = pnand %p1086_p0, %p1080_p11 }
  0x31   :  { %1090 = shalt.err (!%p1087_p1)
}
  0x32   :  { %49 = dma.hbm_to_vmem [thread:$0]  %s1494_s1, 256, %s44_s29, [#allocation6], %s1120_s23, %s1120_s23, %s1121_s24  }
  0x33   :  { %1113 = dma.done.wait [#allocation3], 256  }
  0x34   :  { %1114 = vsyncadd [#allocation3], 4294967040 }
  0x35   :  { %1115 = dma.done.wait [#allocation6], 256  }
  0x36   :  { %1116 = vsyncadd [#allocation6], 4294967040  ;;  %v1123_v0 = vmov 0.0|0.0   ;;  %vm1124_vm0 = vmmov 0   ;;  %v1125_v1 = vmov 0.0   ;;  %vm92_vm1 = vcmask 261120  }
  0x37   :  { %963 = vmatprep.subr.bf16.mxu0 %v1123_v0  ;;  %881 = vmatprep.mubr.msk.f32.mxu0 %vm1124_vm0, %v1125_v1  ;;  %s1495_s25 = sld [smem:[#allocation13_spill]]  ;;  %v1270_v7 = vld [vmem:[#allocation2] sm:$0xff]  ;;  %v1272_v8 = vld [vmem:[#allocation2 + $0x8] sm:$0xff]  ;;  %vm107_vm2 = vcmask 1040384   ;;  %v203_v27 = vld [vmem:[%s1468_s3 + $0x10] sm:$0xff]  ;;  %v446_v62 = vlaneseq }
  0x38   :  { %981 = vmatprep.subr.bf16.mxu1 %v1123_v0  ;;  %914 = vmatprep.mubr.msk.f32.mxu1 %vm1124_vm0, %v1125_v1  ;;  %v93_v9 = vsel %vm92_vm1, %v1270_v7, 0.0  ;;  %v100_v10 = vsel %vm92_vm1, %v1272_v8, 0.0  ;;  %v201_v20 = vld [vmem:[%s1468_s3] sm:$0xff]  ;;  %v202_v21 = vld [vmem:[%s1468_s3 + $0x8] sm:$0xff]  ;;  %v204_v28 = vld [vmem:[%s1468_s3 + $0x18] sm:$0xff] }
  0x39   :  { %v94_v12 = vrot.slane %v93_v9, 4  ;;  %v101_v13 = vrot.slane %v100_v10, 4  ;;  %v970_v26 = vpack.c.bf16 %v202_v21, %v201_v20  ;;  %v973_v30 = vpack.c.bf16 %v204_v28, %v203_v27  ;;  %v90_v31 = vld [vmem:[#allocation5] sm:$0xff]  ;;  %v91_v32 = vld [vmem:[#allocation5 + $0x8] sm:$0xff]  ;;  %v285_v43 = vld [vmem:[%s1472_s7] sm:$0xff] }
  0x3a   :  { %v109_v33 = vsel %vm92_vm1, %v90_v31, 0.0  ;;  %v116_v34 = vsel %vm92_vm1, %v91_v32, 0.0  ;;  %v286_v44 = vld [vmem:[%s1472_s7 + $0x8] sm:$0xff]  ;;  %v287_v48 = vld [vmem:[%s1472_s7 + $0x10] sm:$0xff]  ;;  %v288_v49 = vld [vmem:[%s1472_s7 + $0x18] sm:$0xff]  ;;  %v447_v63 = vshrl.u32 %v446_v62, 7 }
  0x3b   :  { %v95_v14 = vadd.f32 %v94_v12, %v93_v9  ;;  %v102_v15 = vadd.f32 %v101_v13, %v100_v10  ;;  %v110_v35 = vrot.slane %v109_v33, 4  ;;  %v117_v36 = vrot.slane %v116_v34, 4  ;;  %v362_v56 = vld [vmem:[%s1473_s8] sm:$0xff]  ;;  %v363_v57 = vld [vmem:[%s1473_s8 + $0x8] sm:$0xff]  ;;  %v364_v58 = vld [vmem:[%s1473_s8 + $0x10] sm:$0xff] }
  0x3c   :  { %v976_v45 = vpack.c.bf16 %v286_v44, %v285_v43  ;;  %v979_v52 = vpack.c.bf16 %v288_v49, %v287_v48  ;;  %v982_v59 = vpack.c.bf16 %v363_v57, %v362_v56  ;;  %v365_v60 = vld [vmem:[%s1473_s8 + $0x18] sm:$0xff]  ;;  %v817_v32 = vld [vmem:[%s1474_s9] ss:$0 sm:$0xff]  ;;  %s1126_s9 = smov [#allocation7]  }
  0x3d   :  { %v124_v2 = vld [vmem:[%s1495_s25] sm:$0xff]  ;;  %v125_v3 = vld [vmem:[%s1495_s25 + $0x8] sm:$0xff]  ;;  %v126_v4 = vld [vmem:[%s1495_s25 + $0x10] sm:$0xff]  ;;  %v96_v16 = vrot.slane %v95_v14, 2  ;;  %v103_v17 = vrot.slane %v102_v15, 2  ;;  %v111_v37 = vadd.f32 %v110_v35, %v109_v33  ;;  %v118_v38 = vadd.f32 %v117_v36, %v116_v34  ;;  %s800_s30 = sshll.u32 %s1126_s9, 4  ;;  %s801_s30 = int_to_ptr.vmem [resolvable:$true] %s800_s30 }
  0x3e   :  { %v964_v5 = vpack.c.bf16 %v125_v3, %v124_v2  ;;  %v127_v6 = vld [vmem:[%s1495_s25 + $0x18] sm:$0xff]  ;;  %983 = vmatpush3.bf16.msra.mxu1 %v982_v59  ;;  %v985_v61 = vpack.c.bf16 %v365_v60, %v364_v58  ;;  %v448_v2 = vsub.s32 0, %v447_v63  ;;  %v452_v3 = vsub.s32 1, %v447_v63  ;;  %v819_v35 = vld [vmem:[%s1470_s5] ss:$0 sm:$0xff]  ;;  %v557_v63 = vld [vmem:[%s1477_s12 + $0x10] sm:$0xff]  ;;  %p1096_p3 = scmp.lt.s32.totalorder %s801_s30, %s801_s30 }
  0x3f   :  { %v967_v11 = vpack.c.bf16 %v127_v6, %v126_v4  ;;  %v97_v18 = vadd.f32 %v96_v16, %v95_v14  ;;  %v104_v19 = vadd.f32 %v103_v17, %v102_v15  ;;  %v112_v39 = vrot.slane %v111_v37, 2  ;;  %984 = vmatprep.subr.bf16.mxu1 %v1123_v0  ;;  %v555_v60 = vld [vmem:[%s1477_s12] sm:$0xff]  ;;  %s1091_s19 = scalar_lea.vmem %s801_s30, 256 }
  0x40   :  { %965 = vmatpush3.bf16.msra.mxu0 %v964_v5  ;;  %v119_v40 = vrot.slane %v118_v38, 2  ;;  %p1092_p2 = scmp.ne.s32.totalorder %s801_s30, %s1091_s19  ;;  %p1097_p4 = scmp.lt.s32.totalorder %s1091_s19, %s1091_s19 }
  0x41   :  { %966 = vmatprep.subr.bf16.mxu0 %v1123_v0  ;;  %v98_v22 = vrot.slane %v97_v18, 1  ;;  %v105_v23 = vrot.slane %v104_v19, 1  ;;  %v113_v41 = vadd.f32 %v112_v39, %v111_v37  ;;  %v820_v37 = vld [vmem:[%s1471_s6] ss:$0 sm:$0xff]  ;;  %s1496_s6 = sld [smem:[#allocation14_spill]] }
  0x42   :  { %v120_v42 = vadd.f32 %v119_v40, %v118_v38  ;;  %986 = vmatpush3.bf16.msra.mxu1 %v985_v61  ;;  %v556_v61 = vld [vmem:[%s1477_s12 + $0x8] sm:$0xff]  ;;  %p1098_p5 = por %p1097_p4, %p1096_p3 }
  0x43   :  { %v99_v24 = vadd.f32 %v98_v22, %v97_v18  ;;  %v106_v25 = vadd.f32 %v105_v23, %v104_v19  ;;  %v114_v46 = vrot.slane %v113_v41, 1  ;;  %v987_v62 = vpack.c.bf16 %v556_v61, %v555_v60 }
  0x44   :  { %968 = vmatpush3.bf16.msra.mxu0 %v967_v11  ;;  %v121_v47 = vrot.slane %v120_v42, 1  ;;  %p1099_p6 = pnand %p1098_p5, %p1092_p2 }
  0x45   :  { %969 = vmatprep.subr.bf16.mxu0 %v1123_v0  ;;  %v108_v29 = vsel %vm107_vm2, %v99_v24, %v106_v25  ;;  %v115_v53 = vadd.f32 %v114_v46, %v113_v41 }
  0x46   :  { %v122_v54 = vadd.f32 %v121_v47, %v120_v42 }
  0x47   :  { %882 = vmatmul.mubr.msk.f32.vlgmr.msra.gmra.mrb[0].mxu0 %vm92_vm1, %v108_v29 }
  0x48   :  { %971 = vmatpush3.bf16.msra.mxu0 %v970_v26  ;;  %892 = vmatprep.mubr.msk.f32.mxu0 %vm1124_vm0, %v1125_v1  ;;  %v123_v55 = vsel %vm107_vm2, %v115_v53, %v122_v54 }
  0x49   :  { %972 = vmatprep.subr.bf16.mxu0 %v1123_v0 }
  0x4c   :  { %974 = vmatpush3.bf16.msra.mxu0 %v973_v30 }
  0x4d   :  { %975 = vmatprep.subr.bf16.mxu0 %v1123_v0 }
 0x11a   :  { %v197_v50 = vpop.f32.mrb[0].mxu0 }
 0x11b   :  { %v883_v51 = vpop.f32.mrb[1].mxu0  ;;  %893 = vmatmul.mubr.msk.f32.vlgmr.msra.gmra.mrb[2].mxu0 %vm92_vm1, %v197_v50 }
 0x11c   :  { %977 = vmatpush3.bf16.msra.mxu0 %v976_v45  ;;  %903 = vmatprep.mubr.msk.f32.mxu0 %vm1124_vm0, %v1125_v1  ;;  %v814_v1 = vld [vmem:[%s1469_s4] ss:$0 sm:$0xff] }
 0x11d   :  { %978 = vmatprep.subr.bf16.mxu0 %v1123_v0 }
 0x120   :  { %980 = vmatpush3.bf16.msra.mxu0 %v979_v52 }
 0x121   :  { %988 = vmatprep.subr.bf16.mxu0 %v987_v62 }
 0x123   :  { %904 = vmatmul.mubr.msk.f32.vlgmr.msra.gmra.mrb[4].mxu0 %vm92_vm1, %v123_v55 }
 0x124   :  { %990 = vmatpush3.bf16.msra.mxu0 %v987_v62 }
 0x1ee   :  { %v281_v4 = vpop.f32.mrb[2].mxu0 }
 0x1ef   :  { %v282_v5 = vadd.f32 %v814_v1, %v281_v4  ;;  %v894_v6 = vpop.f32.mrb[3].mxu0  ;;  %v558_v1 = vld [vmem:[%s1477_s12 + $0x18] sm:$0xff]  ;;  %v650_v4 = vld [vmem:[%s1479_s14 + $0x8] sm:$0xff] }
 0x1f1   :  { %v449_v9 = vrot.slane %v282_v5, %v448_v2  ;;  %v453_v10 = vrot.slane %v282_v5, %v452_v3  ;;  %v651_v5 = vld [vmem:[%s1479_s14 + $0x10] sm:$0xff] }
 0x1f3   :  { %v462_v11 = vadd.f32 %v449_v9, %v1270_v7  ;;  %v463_v0 = vadd.f32 %v453_v10, %v1272_v8  ;;  %v652_v9 = vld [vmem:[%s1479_s14 + $0x18] sm:$0xff] }
 0x1f4   :  { %v999_v10 = vpack.c.bf16 %v652_v9, %v651_v5 }
 0x1f5   :  { %v466_v12 = vsel %vm92_vm1, %v462_v11, 0.0  ;;  %v469_v15 = vsel %vm92_vm1, %v463_v0, 0.0 }
 0x1f6   :  { %467 = vadd.xlane.f32.xlu0 %v466_v12  ;;  %v358_v13 = vpop.f32.mrb[4].mxu0  ;;  %v654_v12 = vld [vmem:[%s1479_s14 + $0x28] sm:$0xff] }
 0x1f7   :  { %915 = vmatmul.mubr.msk.f32.vlgmr.msra.gmra.mrb[0].mxu1 %vm92_vm1, %v358_v13  ;;  %v905_v14 = vpop.f32.mrb[5].mxu0  ;;  %v655_v13 = vld [vmem:[%s1479_s14 + $0x30] sm:$0xff] }
 0x1f8   :  { %v656_v14 = vld [vmem:[%s1479_s14 + $0x38] sm:$0xff] }
 0x1fa   :  { %470 = vadd.xlane.f32.xlu0 %v469_v15  ;;  %v1007_v15 = vpack.c.bf16 %v656_v14, %v655_v13  ;;  %v827_v13 = vld [vmem:[%s1481_s16] ss:$0 sm:$0xff] }
 0x283   :  { %v468_v16 = vpop.xlane.xlu0 %467 }
 0x284   :  { %v473_v17 = vmul.f32 0.03125, %v468_v16  ;;  %v657_v16 = vld [vmem:[%s1479_s14 + $0x40] sm:$0xff] }
 0x286   :  { %v475_v18 = vsub.f32 %v462_v11, %v473_v17  ;;  %v653_v11 = vld [vmem:[%s1479_s14 + $0x20] sm:$0xff]  ;;  %v658_v17 = vld [vmem:[%s1479_s14 + $0x48] sm:$0xff] }
 0x287   :  { %v471_v19 = vpop.xlane.xlu0 %470 }
 0x288   :  { %v474_v20 = vmul.f32 0.03125, %v471_v19  ;;  %v477_v21 = vmul.f32 %v475_v18, %v475_v18  ;;  %v659_v19 = vld [vmem:[%s1479_s14 + $0x50] sm:$0xff] }
 0x28a   :  { %v476_v22 = vsub.f32 %v463_v0, %v474_v20  ;;  %v479_v7 = vsel %vm92_vm1, %v477_v21, 0.0  ;;  %v1003_v0 = vpack.c.bf16 %v654_v12, %v653_v11  ;;  %v660_v20 = vld [vmem:[%s1479_s14 + $0x58] sm:$0xff] }
 0x28b   :  { %480 = vadd.xlane.f32.xlu1 %v479_v7  ;;  %v1015_v21 = vpack.c.bf16 %v660_v20, %v659_v19  ;;  %v662_v7 = vld [vmem:[%s1479_s14 + $0x68] sm:$0xff] }
 0x28c   :  { %v478_v23 = vmul.f32 %v476_v22, %v476_v22 }
 0x28e   :  { %v482_v8 = vsel %vm92_vm1, %v478_v23, 0.0 }
 0x28f   :  { %483 = vadd.xlane.f32.xlu1 %v482_v8 }
 0x2ca   :  { %v442_v24 = vpop.f32.mrb[0].mxu1 }
 0x2cb   :  { %v916_v25 = vpop.f32.mrb[1].mxu1  ;;  %v443_v33 = vadd.f32 %v817_v32, %v442_v24  ;;  %v822_v32 = vld [vmem:[%s1476_s11] ss:$0 sm:$0xff] }
 0x2cd   :  { %v457_v38 = vrot.slane %v443_v33, %v448_v2  ;;  %v461_v43 = vrot.slane %v443_v33, %v452_v3  ;;  %v991_v2 = vpack.c.bf16 %v558_v1, %v557_v63  ;;  %v649_v3 = vld [vmem:[%s1479_s14] sm:$0xff] }
 0x2ce   :  { %v995_v6 = vpack.c.bf16 %v650_v4, %v649_v3 }
 0x2cf   :  { %992 = vmatprep.subr.bf16.mxu0 %v991_v2 }
 0x2d0   :  { %994 = vmatpush3.bf16.msra.mxu0 %v991_v2  ;;  %996 = vmatprep.subr.bf16.mxu1 %v995_v6 }
 0x2d1   :  { %998 = vmatpush3.bf16.msra.mxu1 %v995_v6 }
 0x2d2   :  { %1000 = vmatprep.subr.bf16.mxu1 %v999_v10 }
 0x2d5   :  { %1002 = vmatpush3.bf16.msra.mxu1 %v999_v10 }
 0x2d6   :  { %1004 = vmatprep.subr.bf16.mxu1 %v1003_v0 }
 0x2d9   :  { %1006 = vmatpush3.bf16.msra.mxu1 %v1003_v0 }
 0x2da   :  { %1008 = vmatprep.subr.bf16.mxu1 %v1007_v15 }
 0x2dd   :  { %1010 = vmatpush3.bf16.msra.mxu1 %v1007_v15 }
 0x318   :  { %v481_v26 = vpop.xlane.xlu1 %480 }
 0x319   :  { %v485_v27 = vmul.f32 0.03125, %v481_v26 }
 0x31b   :  { %v487_v28 = vadd.f32 1e-05, %v485_v27 }
 0x31c   :  { %v484_v29 = vpop.xlane.xlu1 %483 }
 0x31d   :  { %1035 = vrsqrt.f32 %v487_v28  ;;  %v486_v30 = vmul.f32 0.03125, %v484_v29 }
 0x31f   :  { %v488_v31 = vadd.f32 1e-05, %v486_v30  ;;  %v821_v30 = vld [vmem:[%s1475_s10] ss:$0 sm:$0xff] }
 0x321   :  { %1037 = vrsqrt.f32 %v488_v31 }
 0x327   :  { %v1036_v34 = vpop.eup %1035 }
 0x328   :  { %v491_v36 = vmul.f32 %v1036_v34, %v475_v18  ;;  %v1011_v18 = vpack.c.bf16 %v658_v17, %v657_v16  ;;  %v828_v17 = vld [vmem:[%s1496_s6] ss:$0 sm:$0xff] }
 0x32a   :  { %v499_v39 = vmul.f32 %v819_v35, %v491_v36  ;;  %1012 = vmatprep.subr.bf16.mxu1 %v1011_v18 }
 0x32b   :  { %v1038_v40 = vpop.eup %1037  ;;  %1014 = vmatpush3.bf16.msra.mxu1 %v1011_v18 }
 0x32c   :  { %v507_v41 = vadd.f32 %v820_v37, %v499_v39  ;;  %v492_v42 = vmul.f32 %v1038_v40, %v476_v22  ;;  %v661_v22 = vld [vmem:[%s1479_s14 + $0x60] sm:$0xff]  ;;  %1016 = vmatprep.subr.bf16.mxu1 %v1015_v21  ;;  %v663_v39 = vld [vmem:[%s1479_s14 + $0x70] sm:$0xff]  ;;  %v664_v40 = vld [vmem:[%s1479_s14 + $0x78] sm:$0xff] }
 0x32d   :  { %v1019_v23 = vpack.c.bf16 %v662_v7, %v661_v22 }
 0x32e   :  { %v509_v44 = vadd.f32 %v507_v41, %v457_v38  ;;  %v500_v45 = vmul.f32 %v819_v35, %v492_v42  ;;  %v1023_v41 = vpack.c.bf16 %v664_v40, %v663_v39  ;;  %v823_v42 = vld [vmem:[%s1478_s13] ss:$0 sm:$0xff] }
 0x32f   :  { %1018 = vmatpush3.bf16.msra.mxu1 %v1015_v21 }
 0x330   :  { %v513_v46 = vsel %vm92_vm1, %v509_v44, 0.0  ;;  %v508_v47 = vadd.f32 %v820_v37, %v500_v45  ;;  %1020 = vmatprep.subr.bf16.mxu1 %v1019_v23 }
 0x331   :  { %514 = vadd.xlane.f32.xlu0 %v513_v46 }
 0x332   :  { %v510_v48 = vadd.f32 %v508_v47, %v461_v43 }
 0x333   :  { %1022 = vmatpush3.bf16.msra.mxu1 %v1019_v23 }
 0x334   :  { %v516_v49 = vsel %vm92_vm1, %v510_v48, 0.0  ;;  %1024 = vmatprep.subr.bf16.mxu1 %v1023_v41 }
 0x335   :  { %517 = vadd.xlane.f32.xlu1 %v516_v49  ;;  %v826_v49 = vld [vmem:[%s1480_s15] ss:$0 sm:$0xff] }
 0x337   :  { %1026 = vmatpush3.bf16.msra.mxu1 %v1023_v41 }
 0x3be   :  { %v515_v50 = vpop.xlane.xlu0 %514 }
 0x3bf   :  { %v519_v51 = vmul.f32 0.03125, %v515_v50 }
 0x3c1   :  { %v1352_v52 = vsub.f32 %v509_v44, %v519_v51 }
 0x3c2   :  { %v518_v53 = vpop.xlane.xlu1 %517 }
 0x3c3   :  { %v520_v54 = vmul.f32 0.03125, %v518_v53  ;;  %v523_v55 = vmul.f32 %v1352_v52, %v1352_v52 }
 0x3c5   :  { %v1356_v56 = vsub.f32 %v510_v48, %v520_v54  ;;  %v525_v57 = vsel %vm92_vm1, %v523_v55, 0.0 }
 0x3c6   :  { %526 = vadd.xlane.f32.xlu0 %v525_v57 }
 0x3c7   :  { %v524_v58 = vmul.f32 %v1356_v56, %v1356_v56 }
 0x3c9   :  { %v528_v59 = vsel %vm92_vm1, %v524_v58, 0.0 }
 0x3ca   :  { %529 = vadd.xlane.f32.xlu1 %v528_v59 }
 0x453   :  { %v527_v8 = vpop.xlane.xlu0 %526 }
 0x454   :  { %v531_v24 = vmul.f32 0.03125, %v527_v8 }
 0x456   :  { %v533_v25 = vadd.f32 1e-05, %v531_v24 }
 0x457   :  { %v530_v26 = vpop.xlane.xlu1 %529 }
 0x458   :  { %1039 = vrsqrt.f32 %v533_v25  ;;  %v532_v27 = vmul.f32 0.03125, %v530_v26 }
 0x45a   :  { %v534_v28 = vadd.f32 1e-05, %v532_v27 }
 0x45c   :  { %1041 = vrsqrt.f32 %v534_v28 }
 0x462   :  { %v1040_v29 = vpop.eup %1039 }
 0x463   :  { %v537_v31 = vmul.f32 %v1040_v29, %v1352_v52 }
 0x465   :  { %v545_v33 = vmul.f32 %v821_v30, %v537_v31 }
 0x466   :  { %v1042_v34 = vpop.eup %1041 }
 0x467   :  { %v538_v35 = vmul.f32 %v1042_v34, %v1356_v56  ;;  %v553_v36 = vadd.f32 %v822_v32, %v545_v33 }
 0x469   :  { %v546_v37 = vmul.f32 %v821_v30, %v538_v35  ;;  %925 = vmatprep.mubr.msk.f32.mxu0 %vm92_vm1, %v553_v36 }
 0x46b   :  { %v554_v38 = vadd.f32 %v822_v32, %v546_v37 }
 0x46d   :  { %926 = vmatmul.mubr.msk.f32.vlgmr.msra.gmra.mrb[6].mxu0 %vm92_vm1, %v554_v38 }
 0x540   :  { %v927_v43 = vpop.f32.mrb[6].mxu0 }
 0x541   :  { %v644_v44 = vadd.f32 %v927_v43, %v823_v42  ;;  %v638_v45 = vpop.f32.mrb[7].mxu0 }
 0x542   :  { %v639_v46 = vadd.f32 %v823_v42, %v638_v45 }
 0x543   :  { %v648_v48 = vmax.f32 %v644_v44, 0.0 }
 0x544   :  { %v647_v47 = vmax.f32 %v639_v46, 0.0 }
 0x546   :  { %960 = vmatprep.mubr.f32.mxu1 %v647_v47 }
 0x547   :  { %961 = vmatmul.mubr.f32.vlgmr.msra.gmra.mrb[2].mxu1 %v648_v48 }
 0x61a   :  { %v962_v50 = vpop.f32.mrb[2].mxu1 }
 0x61b   :  { %v744_v51 = vadd.f32 %v962_v50, %v826_v49  ;;  %v738_v52 = vpop.f32.mrb[3].mxu1 }
 0x61c   :  { %v739_v53 = vadd.f32 %v826_v49, %v738_v52 }
 0x61d   :  { %v748_v54 = vadd.f32 %v744_v51, %v554_v38 }
 0x61e   :  { %v747_v55 = vadd.f32 %v739_v53, %v553_v36 }
 0x61f   :  { %v754_v56 = vsel %vm92_vm1, %v748_v54, 0.0 }
 0x620   :  { %755 = vadd.xlane.f32.xlu1 %v754_v56  ;;  %v751_v57 = vsel %vm92_vm1, %v747_v55, 0.0 }
 0x621   :  { %752 = vadd.xlane.f32.xlu0 %v751_v57 }
 0x6ad   :  { %v756_v58 = vpop.xlane.xlu1 %755 }
 0x6ae   :  { %v758_v59 = vmul.f32 0.03125, %v756_v58  ;;  %v753_v60 = vpop.xlane.xlu0 %752 }
 0x6af   :  { %v757_v61 = vmul.f32 0.03125, %v753_v60 }
 0x6b0   :  { %v760_v62 = vsub.f32 %v748_v54, %v758_v59 }
 0x6b1   :  { %v759_v63 = vsub.f32 %v747_v55, %v757_v61 }
 0x6b2   :  { %v762_v1 = vmul.f32 %v760_v62, %v760_v62 }
 0x6b3   :  { %v761_v2 = vmul.f32 %v759_v63, %v759_v63 }
 0x6b4   :  { %v766_v3 = vsel %vm92_vm1, %v762_v1, 0.0 }
 0x6b5   :  { %767 = vadd.xlane.f32.xlu1 %v766_v3  ;;  %v763_v4 = vsel %vm92_vm1, %v761_v2, 0.0 }
 0x6b6   :  { %764 = vadd.xlane.f32.xlu0 %v763_v4 }
 0x742   :  { %v768_v5 = vpop.xlane.xlu1 %767 }
 0x743   :  { %v770_v6 = vmul.f32 0.03125, %v768_v5  ;;  %v765_v9 = vpop.xlane.xlu0 %764 }
 0x744   :  { %v769_v10 = vmul.f32 0.03125, %v765_v9 }
 0x745   :  { %v772_v11 = vadd.f32 1e-05, %v770_v6 }
 0x746   :  { %v771_v12 = vadd.f32 1e-05, %v769_v10 }
 0x747   :  { %1043 = vrsqrt.f32 %v772_v11 }
 0x748   :  { %1045 = vrsqrt.f32 %v771_v12 }
 0x751   :  { %v1044_v0 = vpop.eup %1043 }
 0x752   :  { %v1046_v14 = vpop.eup %1045  ;;  %v776_v15 = vmul.f32 %v1044_v0, %v760_v62 }
 0x753   :  { %v775_v16 = vmul.f32 %v1046_v14, %v759_v63 }
 0x754   :  { %v784_v18 = vmul.f32 %v827_v13, %v776_v15 }
 0x755   :  { %v783_v19 = vmul.f32 %v827_v13, %v775_v16 }
 0x756   :  { %v792_v20 = vadd.f32 %v828_v17, %v784_v18 }
 0x757   :  { %v791_v21 = vadd.f32 %v828_v17, %v783_v19 }
 0x758   :  { %794 = vst.msk [vmem:[#allocation7 + $0x8] sm:$0xff] %vm92_vm1, %v792_v20 }
 0x759   :  { %793 = vst.msk [vmem:[#allocation7] sm:$0xff] %vm92_vm1, %v791_v21 }
 0x75a   :  { %1102 = shalt.err (!%p1099_p6)
}
 0x75b   :  { %s1497_s20 = sld [smem:[#allocation15_spill]] }
 0x761   :  { %s1103_s7 = scalar_lea.hbm %s1497_s20, 256 }
 0x762   :  { %p1104_p7 = scmp.ne.s32.totalorder %s1497_s20, %s1103_s7  ;;  %p1107_p8 = scmp.lt.u32.totalorder %s1103_s7, %s1497_s20 }
 0x764   :  { %p1109_p9 = pnand %p1107_p8, %p1104_p7 }
 0x766   :  { %1112 = shalt.err (!%p1109_p9)
}
 0x767   :  { %806 = dma.vmem_to_hbm [thread:$0]  %s801_s30, 256, %s1497_s20, [#allocation4], %s1120_s23, %s1120_s23, %s1121_s24  }
 0x768   :  { %1117 = dma.done.wait [#allocation4], 256  }
 0x769   :  { %1118 = vsyncadd [#allocation4], 4294967040 }
 0x76a   :  { %810 = vsyncpa [#allocation3], 1 }
 0x76b   :  { %811 = vsyncpa [#allocation6], 1 }
 0x76c   :  { %812 = vsyncpa [#allocation4], 1 }

</bundles_post_ra>
